<compile_context>
chip_gen: v5e
topology: v5e:2x2
jax: 0.10.0
libtpu: 0.0.40
codegen_flags: <defaults>
</compile_context>

<pallas_src>
import functools

import jax
import jax.numpy as jnp
from jax.experimental import pallas as pl
from jax.experimental.pallas import tpu as pltpu


def _default_min_grid_steps():
    """v7x has 2 TensorCores -> keep the ('parallel',) grid axis >= 2 there."""
    try:
        kind = jax.devices()[0].device_kind.lower()
    except Exception:
        return 1
    return 2 if "v7" in kind else 1


def _pick_tb(B, N, C, c_out, gdep, mm_bytes, out_bytes, min_grid_steps, budget):
    """Largest divisor of B with 128-lane-aligned blocks that fits the VMEM budget."""
    divisors = sorted((d for d in range(1, B + 1) if B % d == 0), reverse=True)

    def aligned(d):
        # Block last dim must be a multiple of 128 unless it equals the full dim.
        return d == B or ((d * C) % 128 == 0 and (d * c_out) % 128 == 0)

    def fits(d):
        xblk = N * d * C * 4 * 2                                   # x block, f32, 2 bufs
        oblk = N * d * c_out * out_bytes * 2                       # out block, 2 bufs
        wblk = (gdep + 1) * (d * C) * (d * c_out) * mm_bytes * 2   # block-diag W, 2 bufs
        ablk = N * N * mm_bytes * 2                                # adjacency, 2 bufs
        tmps = N * d * C * (2 * 4 + mm_bytes) + N * d * c_out * 4  # h, ax, h_m, acc
        return xblk + oblk + wblk + ablk + tmps <= budget

    for enforce_min_steps in (True, False):
        for d in divisors:
            if enforce_min_steps and min_grid_steps > 1 and (B // d) < min_grid_steps:
                continue
            if aligned(d) and fits(d):
                return d
    # Last resort: smallest spec-legal divisor (tb == B is always legal).
    return min(d for d in divisors if aligned(d))


def _mixprop_kernel(a_ref, w_ref, b_ref, x_ref, o_ref, *, gdep, alpha, matmul_dtype):
    """One batch-chunk (TB batch elements) per grid step.

    a_ref : (N, N)                          normalized adjacency (matmul_dtype)
    w_ref : (gdep+1, TB*C, TB*c_out)        per-hop block-diagonal weights (matmul_dtype)
    b_ref : (1, TB*c_out)                   bias replicated per batch element (f32)
    x_ref : (N, TB*C)                       x chunk, layout [n, b*C + c]
    o_ref : (N, TB*c_out)                   output, layout [n, b*c_out + o]
    """
    A = a_ref[...]                                    # (N, N)
    x = x_ref[...].astype(jnp.float32)                # (N, TB*C)
    ax = alpha * x                                    # hoisted out of the hop loop
    one_minus_alpha = 1.0 - alpha

    # Hop 0: acc = x @ W_blk[0]. Cast of h is shared by the A-matmul and W-matmul.
    h_m = x.astype(matmul_dtype)
    acc = jnp.dot(h_m, w_ref[0], preferred_element_type=jnp.float32)  # (N, TB*c_out)

    for k in range(1, gdep + 1):                      # gdep static -> unrolled
        # h_k = alpha*x + (1-alpha) * A @ h_{k-1}; mix kept in f32.
        h = ax + one_minus_alpha * jnp.dot(A, h_m, preferred_element_type=jnp.float32)
        h_m = h.astype(matmul_dtype)
        acc = acc + jnp.dot(h_m, w_ref[k], preferred_element_type=jnp.float32)

    o_ref[...] = jnp.maximum(acc + b_ref[...], 0.0).astype(o_ref.dtype)


def mixprop_gcn(x, norm_adj, weight_t, bias, *, gdep, alpha, dropout_prob=0.0,
                tb=None, matmul_dtype=jnp.bfloat16, min_grid_steps=None,
                vmem_limit_bytes=32 * 1024 * 1024):
    """x: (B,N,C), norm_adj: (N,N), weight_t: ((gdep+1)*C, out_dim), bias: (out_dim,)."""
    if dropout_prob > 0:
        raise NotImplementedError("dropout_prob > 0 not supported")  # TODO(synk)

    B, N, C = x.shape
    c_in, c_out = weight_t.shape
    assert c_in == (gdep + 1) * C

    mm_bytes = int(jnp.dtype(matmul_dtype).itemsize)
    out_bytes = int(jnp.dtype(x.dtype).itemsize)

    if min_grid_steps is None:
        min_grid_steps = _default_min_grid_steps()
    if tb is None:
        tb = _pick_tb(B, N, C, c_out, gdep, mm_bytes, out_bytes,
                      min_grid_steps, budget=(vmem_limit_bytes * 3) // 4)
    assert B % tb == 0
    if tb != B:
        assert (tb * C) % 128 == 0 and (tb * c_out) % 128 == 0
    grid = (B // tb,)

    # Fold batch into lanes: x_f[n, b*C + c] = x[b, n, c].
    # NOTE: this transpose (and the inverse on the output) is a real HBM pass;
    # at production sizes prefer emitting/consuming the folded layout directly.
    x_f = jnp.transpose(x, (1, 0, 2)).reshape(N, B * C)
    A = norm_adj.astype(matmul_dtype)

    # Per-hop block-diagonal weights: W_blk[k, b*C + c, b*c_out + o] = W[k, c, o].
    Wh = weight_t.reshape(gdep + 1, C, c_out)
    eye = jnp.eye(tb, dtype=weight_t.dtype)
    W_blk = jnp.einsum("bd,kco->kbcdo", eye, Wh).reshape(
        gdep + 1, tb * C, tb * c_out).astype(matmul_dtype)
    bias_blk = jnp.tile(bias.astype(jnp.float32), (tb,)).reshape(1, tb * c_out)

    kernel = functools.partial(_mixprop_kernel, gdep=gdep, alpha=float(alpha),
                               matmul_dtype=matmul_dtype)

    flops = 2 * gdep * N * N * B * C + 2 * (gdep + 1) * B * N * C * c_out
    bytes_accessed = (N * N * mm_bytes + int(W_blk.size) * mm_bytes
                      + N * B * C * out_bytes + N * B * c_out * out_bytes)

    out2 = pl.pallas_call(
        kernel,
        out_shape=jax.ShapeDtypeStruct((N, B * c_out), x.dtype),
        grid_spec=pltpu.PrefetchScalarGridSpec(
            num_scalar_prefetch=0,
            grid=grid,
            in_specs=[
                pl.BlockSpec((N, N), lambda i: (0, 0)),                       # A (shared)
                pl.BlockSpec((gdep + 1, tb * C, tb * c_out),
                             lambda i: (0, 0, 0)),                            # W_blk (shared)
                pl.BlockSpec((1, tb * c_out), lambda i: (0, 0)),              # bias (shared)
                pl.BlockSpec((N, tb * C), lambda i: (0, i)),                  # x chunk
            ],
            out_specs=pl.BlockSpec((N, tb * c_out), lambda i: (0, i)),        # lane-dense out
        ),
        compiler_params=pltpu.CompilerParams(
            dimension_semantics=("parallel",),     # batch chunks -> both v7x TCs
            vmem_limit_bytes=vmem_limit_bytes,
        ),
        cost_estimate=pl.CostEstimate(flops=int(flops), transcendentals=0,
                                      bytes_accessed=int(bytes_accessed)),
    )(A, W_blk, bias_blk, x_f)

    # (N, B*c_out) -> (B, N, c_out)
    return out2.reshape(N, B, c_out).transpose(1, 0, 2)


def _reference(x, norm_adj, weight_t, bias, *, gdep, alpha):
    h = x
    outs = [x]
    for _ in range(gdep):
        h = alpha * x + (1.0 - alpha) * jnp.einsum("hw,bwc->bhc", norm_adj, h)
        outs.append(h)
    ho = jnp.concatenate(outs, axis=-1)
    return jnp.maximum(ho @ weight_t + bias, 0.0)


if __name__ == "__main__":
    # Small deterministic config consistent with the module's forward.
    B, N, in_dim, out_dim, gdep, alpha = 8, 16, 32, 32, 2, 0.3
    c_in = (gdep + 1) * in_dim

    key = jax.random.PRNGKey(0)
    k_x, k_a, k_w, k_b = jax.random.split(key, 4)

    x = jax.random.normal(k_x, (B, N, in_dim), dtype=jnp.float32)

    # Row-normalized adjacency (deterministic).
    a_raw = jax.random.uniform(k_a, (N, N), dtype=jnp.float32)
    norm_adj = a_raw / jnp.sum(a_raw, axis=1, keepdims=True)

    # nn.Linear(c_in, out_dim) init: U(-1/sqrt(c_in), 1/sqrt(c_in)).
    bound = 1.0 / (c_in ** 0.5)
    w_torch = jax.random.uniform(k_w, (out_dim, c_in), dtype=jnp.float32,
                                 minval=-bound, maxval=bound)
    bias = jax.random.uniform(k_b, (out_dim,), dtype=jnp.float32,
                              minval=-bound, maxval=bound)
    weight_t = w_torch.T  # (c_in, out_dim): kernel computes ho @ W + b

    ref = _reference(x, norm_adj, weight_t, bias, gdep=gdep, alpha=alpha)

    # f32 MXU operands: tight check (auto TB).
    out_f32 = jax.block_until_ready(
        mixprop_gcn(x, norm_adj, weight_t, bias, gdep=gdep, alpha=alpha,
                    matmul_dtype=jnp.float32))
    assert out_f32.shape == (B, N, out_dim)
    assert jnp.allclose(out_f32, ref, atol=1e-5, rtol=1e-5)

    # Multi-step grid path (tb < B, grid length 2), still exact in f32.
    out_multi = jax.block_until_ready(
        mixprop_gcn(x, norm_adj, weight_t, bias, gdep=gdep, alpha=alpha,
                    tb=4, matmul_dtype=jnp.float32))
    assert jnp.allclose(out_multi, ref, atol=1e-5, rtol=1e-5)

    # Default fast path: bf16 MXU operands, f32 mix/accumulate -> loose check.
    out_bf16 = jax.block_until_ready(
        mixprop_gcn(x, norm_adj, weight_t, bias, gdep=gdep, alpha=alpha))
    assert out_bf16.shape == (B, N, out_dim)
    assert jnp.allclose(out_bf16, ref, atol=2e-1, rtol=2e-1)

    print("KERNEL_OK")
</pallas_src>

<mosaic_0001>
module attributes {stable_mosaic.version = 11 : i64} {
  func.func @_mixprop_kernel(%arg0: i32, %arg1: memref<16x16xf32, #tpu.memory_space<vmem>>, %arg2: memref<3x256x256xf32, #tpu.memory_space<vmem>>, %arg3: memref<1x256xf32, #tpu.memory_space<vmem>>, %arg4: memref<16x256xf32, #tpu.memory_space<vmem>>, %arg5: memref<16x256xf32, #tpu.memory_space<vmem>>) attributes {dimension_semantics = [#tpu.dimension_semantics<parallel>], iteration_bounds = array<i64: 1>, scalar_prefetch = 0 : i64, scratch_operands = 0 : i64, tpu.core_type = #tpu.core_type<tc>, window_params = [{pipeline_mode = #tpu.pipeline_mode<synchronous>, transform_indices = @transform_0, window_bounds = array<i64: 16, 16>}, {pipeline_mode = #tpu.pipeline_mode<synchronous>, transform_indices = @transform_1, window_bounds = array<i64: 3, 256, 256>}, {pipeline_mode = #tpu.pipeline_mode<synchronous>, transform_indices = @transform_2, window_bounds = array<i64: 1, 256>}, {transform_indices = @transform_3, window_bounds = array<i64: 16, 256>}, {transform_indices = @transform_4, window_bounds = array<i64: 16, 256>}]} {
    %c0 = arith.constant 0 : index
    %c0_0 = arith.constant 0 : index
    %0 = vector.load %arg1[%c0, %c0_0] : memref<16x16xf32, #tpu.memory_space<vmem>>, vector<16x16xf32>
    %c0_1 = arith.constant 0 : index
    %c0_2 = arith.constant 0 : index
    %1 = vector.load %arg4[%c0_1, %c0_2] : memref<16x256xf32, #tpu.memory_space<vmem>>, vector<16x256xf32>
    %cst = arith.constant 3.000000e-01 : f32
    %2 = vector.broadcast %cst : f32 to vector<16x256xf32>
    %3 = arith.mulf %2, %1 : vector<16x256xf32>
    %c0_3 = arith.constant 0 : index
    %c0_4 = arith.constant 0 : index
    %c0_5 = arith.constant 0 : index
    %4 = vector.load %arg2[%c0_3, %c0_4, %c0_5] : memref<3x256x256xf32, #tpu.memory_space<vmem>>, vector<1x256x256xf32>
    %5 = vector.shape_cast %4 : vector<1x256x256xf32> to vector<256x256xf32>
    %cst_6 = arith.constant dense<0.000000e+00> : vector<16x256xf32>
    %6 = tpu.matmul %1, %5, %cst_6 {dimension_numbers = #tpu.dot_dimension_numbers<[1], [0], [0], [1], [0, 0, 1, 1], [], []>} : vector<16x256xf32>, vector<256x256xf32>, vector<16x256xf32> -> vector<16x256xf32>
    %cst_7 = arith.constant dense<0.000000e+00> : vector<16x256xf32>
    %7 = tpu.matmul %0, %1, %cst_7 {dimension_numbers = #tpu.dot_dimension_numbers<[1], [0], [0], [1], [0, 0, 1, 1], [], []>} : vector<16x16xf32>, vector<16x256xf32>, vector<16x256xf32> -> vector<16x256xf32>
    %cst_8 = arith.constant 0.699999988 : f32
    %8 = vector.broadcast %cst_8 : f32 to vector<16x256xf32>
    %9 = arith.mulf %8, %7 : vector<16x256xf32>
    %10 = arith.addf %3, %9 : vector<16x256xf32>
    %c1 = arith.constant 1 : index
    %c0_9 = arith.constant 0 : index
    %c0_10 = arith.constant 0 : index
    %11 = vector.load %arg2[%c1, %c0_9, %c0_10] : memref<3x256x256xf32, #tpu.memory_space<vmem>>, vector<1x256x256xf32>
    %12 = vector.shape_cast %11 : vector<1x256x256xf32> to vector<256x256xf32>
    %cst_11 = arith.constant dense<0.000000e+00> : vector<16x256xf32>
    %13 = tpu.matmul %10, %12, %cst_11 {dimension_numbers = #tpu.dot_dimension_numbers<[1], [0], [0], [1], [0, 0, 1, 1], [], []>} : vector<16x256xf32>, vector<256x256xf32>, vector<16x256xf32> -> vector<16x256xf32>
    %14 = arith.addf %6, %13 : vector<16x256xf32>
    %cst_12 = arith.constant dense<0.000000e+00> : vector<16x256xf32>
    %15 = tpu.matmul %0, %10, %cst_12 {dimension_numbers = #tpu.dot_dimension_numbers<[1], [0], [0], [1], [0, 0, 1, 1], [], []>} : vector<16x16xf32>, vector<16x256xf32>, vector<16x256xf32> -> vector<16x256xf32>
    %cst_13 = arith.constant 0.699999988 : f32
    %16 = vector.broadcast %cst_13 : f32 to vector<16x256xf32>
    %17 = arith.mulf %16, %15 : vector<16x256xf32>
    %18 = arith.addf %3, %17 : vector<16x256xf32>
    %c2 = arith.constant 2 : index
    %c0_14 = arith.constant 0 : index
    %c0_15 = arith.constant 0 : index
    %19 = vector.load %arg2[%c2, %c0_14, %c0_15] : memref<3x256x256xf32, #tpu.memory_space<vmem>>, vector<1x256x256xf32>
    %20 = vector.shape_cast %19 : vector<1x256x256xf32> to vector<256x256xf32>
    %cst_16 = arith.constant dense<0.000000e+00> : vector<16x256xf32>
    %21 = tpu.matmul %18, %20, %cst_16 {dimension_numbers = #tpu.dot_dimension_numbers<[1], [0], [0], [1], [0, 0, 1, 1], [], []>} : vector<16x256xf32>, vector<256x256xf32>, vector<16x256xf32> -> vector<16x256xf32>
    %22 = arith.addf %14, %21 : vector<16x256xf32>
    %c0_17 = arith.constant 0 : index
    %c0_18 = arith.constant 0 : index
    %23 = vector.load %arg3[%c0_17, %c0_18] : memref<1x256xf32, #tpu.memory_space<vmem>>, vector<1x256xf32>
    %24 = vector.broadcast %23 : vector<1x256xf32> to vector<16x256xf32>
    %25 = arith.addf %22, %24 : vector<16x256xf32>
    %cst_19 = arith.constant 0.000000e+00 : f32
    %26 = vector.broadcast %cst_19 : f32 to vector<16x256xf32>
    %27 = arith.maximumf %25, %26 : vector<16x256xf32>
    %c0_20 = arith.constant 0 : index
    %c0_21 = arith.constant 0 : index
    %28 = vector.load %arg5[%c0_20, %c0_21] : memref<16x256xf32, #tpu.memory_space<vmem>>, vector<16x256xf32>
    tpu.vector_store %arg5[%c0_20, %c0_21], %27 {strides = array<i32>} : memref<16x256xf32, #tpu.memory_space<vmem>>, vector<16x256xf32>,
    return
  }
  func.func @transform_0(%arg0: i32) -> (i32, i32) {
    %c0_i32 = arith.constant 0 : i32
    %c0_i32_0 = arith.constant 0 : i32
    %c0_i32_1 = arith.constant 0 : i32
    return %c0_i32, %c0_i32_0 : i32, i32
  }
  func.func @transform_1(%arg0: i32) -> (i32, i32, i32) {
    %c0_i32 = arith.constant 0 : i32
    %c0_i32_0 = arith.constant 0 : i32
    %c0_i32_1 = arith.constant 0 : i32
    %c0_i32_2 = arith.constant 0 : i32
    return %c0_i32, %c0_i32_0, %c0_i32_1 : i32, i32, i32
  }
  func.func @transform_2(%arg0: i32) -> (i32, i32) {
    %c0_i32 = arith.constant 0 : i32
    %c0_i32_0 = arith.constant 0 : i32
    %c0_i32_1 = arith.constant 0 : i32
    return %c0_i32, %c0_i32_0 : i32, i32
  }
  func.func @transform_3(%arg0: i32) -> (i32, i32) {
    %c0_i32 = arith.constant 0 : i32
    %c0_i32_0 = arith.constant 0 : i32
    return %c0_i32, %arg0 : i32, i32
  }
  func.func @transform_4(%arg0: i32) -> (i32, i32) {
    %c0_i32 = arith.constant 0 : i32
    %c0_i32_0 = arith.constant 0 : i32
    return %c0_i32, %arg0 : i32, i32
  }
}

</mosaic_0001>

<bundles_post_ra>
// kernel: tpu_custom_call.1
= control target key start
LH: loop header
LB: loop body
LE: loop exit
PB: predicated region body
PF: predicated region fallthrough
CT: control target
= control target key end

     0   :  { %9 = vsyncpa [#allocation3], 0  ;;  %s980_s0 = inlined_call_operand.hbm [shape: f32[16,16], index: 0, kind: input, shape index: {}]   ;;  %s981_s1 = inlined_call_operand.hbm [shape: f32[3,256,256], index: 1, kind: input, shape index: {}]   ;;  %s982_s2 = inlined_call_operand.hbm [shape: f32[1,256], index: 2, kind: input, shape index: {}]   ;;  %s983_s3 = inlined_call_operand.hbm [shape: f32[16,256], index: 3, kind: input, shape index: {}]   ;;  %s984_s4 = inlined_call_operand.hbm [shape: f32[16,256], index: 4, kind: output, shape index: {}]  }
   0x1   :  { %10 = vsyncpa [#allocation6], 0 }
   0x2   :  { %11 = vsyncpa [#allocation9], 0  ;;  %s30_s17 = sshll.u32 %s981_s1, 4  ;;  %s31_s17 = int_to_ptr.hbm [resolvable:$true] %s30_s17 }
   0x3   :  { %12 = vsyncpa [#allocation4], 0  ;;  %s862_s18 = smov [#allocation5]   ;;  %s17_s22 = sshll.u32 %s980_s0, 4  ;;  %s18_s22 = int_to_ptr.hbm [resolvable:$true] %s17_s22 }
   0x4   :  { %s32_s19 = sshll.u32 %s862_s18, 4  ;;  %s863_s23 = smov 256   ;;  %s33_s19 = int_to_ptr.vmem [resolvable:$true] %s32_s19 }
   0x5   :  { %s864_s24 = smov 16   ;;  %s865_s25 = smov [#allocation2]  }
   0x6   :  { %38 = dma.hbm_to_vmem [thread:$0]  %s31_s17, 24576, %s33_s19, [#allocation6], %s863_s23, %s863_s23, %s864_s24  }
   0x7   :  { %s19_s26 = sshll.u32 %s865_s25, 4  ;;  %s866_s1 = smov 128   ;;  %s20_s26 = int_to_ptr.vmem [resolvable:$true] %s19_s26 }
   0x8   :  { %s867_s27 = smov 8   ;;  %s44_s30 = sshll.u32 %s982_s2, 4  ;;  %s45_s30 = int_to_ptr.hbm [resolvable:$true] %s44_s30 }
   0x9   :  { %25 = dma.hbm_to_vmem [thread:$0]  %s18_s22, 256, %s20_s26, [#allocation3], %s866_s1, %s866_s1, %s867_s27  }
   0xa   :  { %s868_s5 = smov [#allocation7]   ;;  %s54_s8 = sshll.u32 %s983_s3, 4  ;;  %s55_s8 = int_to_ptr.hbm [resolvable:$true] %s54_s8 }
   0xb   :  { %s46_s0 = sshll.u32 %s868_s5, 4  ;;  %s869_s9 = smov [#allocation8]   ;;  %s47_s0 = int_to_ptr.vmem [resolvable:$true] %s46_s0 }
   0xc   :  { %49 = dma.hbm_to_vmem [thread:$0]  %s45_s30, 32, %s47_s0, [#allocation6]  }
   0xd   :  { %s56_s10 = sshll.u32 %s869_s9, 4  ;;  %s57_s10 = int_to_ptr.vmem [resolvable:$true] %s56_s10 }
   0xe   :  { %62 = dma.hbm_to_vmem [thread:$0]  %s55_s8, 512, %s57_s10, [#allocation9], %s863_s23, %s863_s23, %s864_s24  }
   0xf   :  { %854 = dma.done.wait [#allocation3], 256  }
  0x10   :  { %855 = vsyncadd [#allocation3], 4294967040 }
  0x11   :  { %856 = dma.done.wait [#allocation6], 24608  }
  0x12   :  { %857 = vsyncadd [#allocation6], 4294942688 }
  0x13   :  { %858 = dma.done.wait [#allocation9], 512  }
  0x14   :  { %859 = vsyncadd [#allocation9], 4294966784  ;;  %v914_v0 = vld [vmem:[#allocation8 + $0x10] sm:$0xff]  ;;  %v916_v1 = vld [vmem:[#allocation8 + $0x18] sm:$0xff]  ;;  %vm153_vm0 = vcmask 130048   ;;  %s870_s2 = smov [#allocation10]  }
  0x15   :  { %v918_v2 = vld [vmem:[#allocation8] sm:$0xff]  ;;  %174 = vmatpush.msra.mxu0 %v914_v0  ;;  %197 = vmatpush.msra.mxu1 %v916_v1  ;;  %v922_v3 = vld [vmem:[#allocation8 + $0x8] sm:$0xff]  ;;  %v246_v10 = vld [vmem:[#allocation5 + $0x2f8] sm:$0xff]  ;;  %s700_s3 = sshll.u32 %s870_s2, 4  ;;  %s702_s13 = sshll.u32 %s984_s4, 4  ;;  %s701_s3 = int_to_ptr.vmem [resolvable:$true] %s700_s3  ;;  %s703_s13 = int_to_ptr.hbm [resolvable:$true] %s702_s13 }
  0x16   :  { %v924_v4 = vld [vmem:[#allocation2] sm:$0xff]  ;;  %v243_v7 = vld [vmem:[#allocation5 + $0x2e0] sm:$0xff]  ;;  %v244_v12 = vld [vmem:[#allocation5 + $0x2e8] sm:$0xff] }
  0x17   :  { %v245_v5 = vld [vmem:[#allocation5 + $0x2f0] sm:$0xff]  ;;  %175 = vmatpush.msra.mxu0 %v918_v2  ;;  %198 = vmatpush.msra.mxu1 %v922_v3  ;;  %v275_v8 = vld [vmem:[#allocation5 + $0x3e0] sm:$0xff]  ;;  %v278_v13 = vld [vmem:[#allocation5 + $0x3f8] sm:$0xff] }
  0x18   :  { %v277_v6 = vld [vmem:[#allocation5 + $0x3f0] sm:$0xff]  ;;  %717 = vmatmul.msk.f32.vlgmr.msra.gmra.mxu0 %vm153_vm0, %v924_v4  ;;  %719 = vmatmul.msk.f32.vlgmr.msra.gmra.mxu1 %vm153_vm0, %v924_v4  ;;  %v242_v14 = vld [vmem:[#allocation5 + $0x2d8] sm:$0xff]  ;;  %v239_v15 = vld [vmem:[#allocation5 + $0x2c0] sm:$0xff] }
  0x19   :  { %279 = vmatpush.msra.mxu2 %v245_v5  ;;  %302 = vmatpush.msra.mxu3 %v277_v6  ;;  %v241_v9 = vld [vmem:[#allocation5 + $0x2d0] sm:$0xff]  ;;  %v271_v16 = vld [vmem:[#allocation5 + $0x3c0] sm:$0xff]  ;;  %v276_v17 = vld [vmem:[#allocation5 + $0x3e8] sm:$0xff] }
  0x1a   :  { %v273_v11 = vld [vmem:[#allocation5 + $0x3d0] sm:$0xff]  ;;  %325 = vmatpush.msrb.mxu0 %v246_v10  ;;  %348 = vmatpush.msrb.mxu1 %v278_v13  ;;  %v932_v18 = vld [vmem:[#allocation2 + $0x8] sm:$0xff]  ;;  %v240_v21 = vld [vmem:[#allocation5 + $0x2c8] sm:$0xff] }
  0x1b   :  { %280 = vmatpush.msra.mxu2 %v243_v7  ;;  %303 = vmatpush.msra.mxu3 %v275_v8  ;;  %v237_v19 = vld [vmem:[#allocation5 + $0x2b0] sm:$0xff]  ;;  %v274_v22 = vld [vmem:[#allocation5 + $0x3d8] sm:$0xff]  ;;  %v235_v23 = vld [vmem:[#allocation5 + $0x2a0] sm:$0xff] }
  0x1c   :  { %326 = vmatpush.msrb.mxu0 %v244_v12  ;;  %v269_v20 = vld [vmem:[#allocation5 + $0x3b0] sm:$0xff]  ;;  %349 = vmatpush.msrb.mxu1 %v276_v17  ;;  %v267_v24 = vld [vmem:[#allocation5 + $0x3a0] sm:$0xff]  ;;  %v238_v25 = vld [vmem:[#allocation5 + $0x2b8] sm:$0xff] }
  0x1d   :  { %281 = vmatpush.msra.mxu2 %v241_v9  ;;  %304 = vmatpush.msra.mxu3 %v273_v11  ;;  %v272_v26 = vld [vmem:[#allocation5 + $0x3c8] sm:$0xff]  ;;  %v233_v27 = vld [vmem:[#allocation5 + $0x290] sm:$0xff]  ;;  %v270_v30 = vld [vmem:[#allocation5 + $0x3b8] sm:$0xff] }
  0x1e   :  { %327 = vmatpush.msrb.mxu0 %v242_v14  ;;  %v265_v28 = vld [vmem:[#allocation5 + $0x390] sm:$0xff]  ;;  %350 = vmatpush.msrb.mxu1 %v274_v22  ;;  %v236_v29 = vld [vmem:[#allocation5 + $0x2a8] sm:$0xff]  ;;  %v231_v31 = vld [vmem:[#allocation5 + $0x280] sm:$0xff] }
  0x1f   :  { %282 = vmatpush.msra.mxu2 %v239_v15  ;;  %305 = vmatpush.msra.mxu3 %v271_v16  ;;  %v263_v32 = vld [vmem:[#allocation5 + $0x380] sm:$0xff]  ;;  %v234_v33 = vld [vmem:[#allocation5 + $0x298] sm:$0xff]  ;;  %v268_v34 = vld [vmem:[#allocation5 + $0x3a8] sm:$0xff] }
  0x20   :  { %718 = vmatmul.msk.f32.gmra.mxu0 %vm153_vm0, %v932_v18  ;;  %720 = vmatmul.msk.f32.gmra.mxu1 %vm153_vm0, %v932_v18  ;;  %v229_v35 = vld [vmem:[#allocation5 + $0x270] sm:$0xff]  ;;  %v232_v37 = vld [vmem:[#allocation5 + $0x288] sm:$0xff]  ;;  %v266_v38 = vld [vmem:[#allocation5 + $0x398] sm:$0xff] }
  0x21   :  { %283 = vmatpush.msra.mxu2 %v237_v19  ;;  %306 = vmatpush.msra.mxu3 %v269_v20  ;;  %v261_v36 = vld [vmem:[#allocation5 + $0x370] sm:$0xff]  ;;  %v227_v39 = vld [vmem:[#allocation5 + $0x260] sm:$0xff]  ;;  %v230_v41 = vld [vmem:[#allocation5 + $0x278] sm:$0xff] }
  0x22   :  { %328 = vmatpush.msrb.mxu0 %v240_v21  ;;  %351 = vmatpush.msrb.mxu1 %v272_v26  ;;  %v259_v40 = vld [vmem:[#allocation5 + $0x360] sm:$0xff]  ;;  %v264_v42 = vld [vmem:[#allocation5 + $0x388] sm:$0xff]  ;;  %v225_v43 = vld [vmem:[#allocation5 + $0x250] sm:$0xff] }
  0x23   :  { %284 = vmatpush.msra.mxu2 %v235_v23  ;;  %307 = vmatpush.msra.mxu3 %v267_v24  ;;  %v257_v44 = vld [vmem:[#allocation5 + $0x350] sm:$0xff]  ;;  %v228_v45 = vld [vmem:[#allocation5 + $0x268] sm:$0xff]  ;;  %v262_v46 = vld [vmem:[#allocation5 + $0x378] sm:$0xff] }
  0x24   :  { %329 = vmatpush.msrb.mxu0 %v238_v25  ;;  %352 = vmatpush.msrb.mxu1 %v270_v30  ;;  %v223_v47 = vld [vmem:[#allocation5 + $0x240] sm:$0xff]  ;;  %v226_v49 = vld [vmem:[#allocation5 + $0x258] sm:$0xff]  ;;  %v260_v50 = vld [vmem:[#allocation5 + $0x368] sm:$0xff] }
  0x25   :  { %285 = vmatpush.msra.mxu2 %v233_v27  ;;  %308 = vmatpush.msra.mxu3 %v265_v28  ;;  %v255_v48 = vld [vmem:[#allocation5 + $0x340] sm:$0xff]  ;;  %v221_v51 = vld [vmem:[#allocation5 + $0x230] sm:$0xff]  ;;  %v224_v53 = vld [vmem:[#allocation5 + $0x248] sm:$0xff] }
  0x26   :  { %330 = vmatpush.msrb.mxu0 %v236_v29  ;;  %353 = vmatpush.msrb.mxu1 %v268_v34  ;;  %v253_v52 = vld [vmem:[#allocation5 + $0x330] sm:$0xff]  ;;  %v258_v54 = vld [vmem:[#allocation5 + $0x358] sm:$0xff]  ;;  %v219_v55 = vld [vmem:[#allocation5 + $0x220] sm:$0xff] }
  0x27   :  { %286 = vmatpush.msra.mxu2 %v231_v31  ;;  %309 = vmatpush.msra.mxu3 %v263_v32  ;;  %v251_v56 = vld [vmem:[#allocation5 + $0x320] sm:$0xff]  ;;  %v222_v57 = vld [vmem:[#allocation5 + $0x238] sm:$0xff]  ;;  %v256_v58 = vld [vmem:[#allocation5 + $0x348] sm:$0xff] }
  0x28   :  { %331 = vmatpush.msrb.mxu0 %v234_v33  ;;  %354 = vmatpush.msrb.mxu1 %v266_v38  ;;  %v217_v59 = vld [vmem:[#allocation5 + $0x210] sm:$0xff]  ;;  %v220_v61 = vld [vmem:[#allocation5 + $0x228] sm:$0xff]  ;;  %v254_v62 = vld [vmem:[#allocation5 + $0x338] sm:$0xff] }
  0x29   :  { %287 = vmatpush.msra.mxu2 %v229_v35  ;;  %310 = vmatpush.msra.mxu3 %v261_v36  ;;  %v249_v60 = vld [vmem:[#allocation5 + $0x310] sm:$0xff]  ;;  %v215_v63 = vld [vmem:[#allocation5 + $0x200] sm:$0xff]  ;;  %v218_v8 = vld [vmem:[#allocation5 + $0x218] sm:$0xff] }
  0x2a   :  { %332 = vmatpush.msrb.mxu0 %v232_v37  ;;  %355 = vmatpush.msrb.mxu1 %v264_v42  ;;  %v247_v5 = vld [vmem:[#allocation5 + $0x300] sm:$0xff]  ;;  %v119_v6 = vld [vmem:[#allocation5 + $0xf0] sm:$0xff]  ;;  %v252_v9 = vld [vmem:[#allocation5 + $0x328] sm:$0xff] }
  0x2b   :  { %288 = vmatpush.msra.mxu2 %v227_v39  ;;  %311 = vmatpush.msra.mxu3 %v259_v40  ;;  %v151_v7 = vld [vmem:[#allocation5 + $0x1f0] sm:$0xff]  ;;  %v117_v10 = vld [vmem:[#allocation5 + $0xe0] sm:$0xff]  ;;  %v216_v12 = vld [vmem:[#allocation5 + $0x208] sm:$0xff] }
  0x2c   :  { %333 = vmatpush.msrb.mxu0 %v230_v41  ;;  %356 = vmatpush.msrb.mxu1 %v262_v46  ;;  %v149_v11 = vld [vmem:[#allocation5 + $0x1e0] sm:$0xff]  ;;  %v250_v13 = vld [vmem:[#allocation5 + $0x318] sm:$0xff]  ;;  %v115_v14 = vld [vmem:[#allocation5 + $0xd0] sm:$0xff] }
  0x2d   :  { %289 = vmatpush.msra.mxu2 %v225_v43  ;;  %312 = vmatpush.msra.mxu3 %v257_v44  ;;  %v147_v15 = vld [vmem:[#allocation5 + $0x1d0] sm:$0xff]  ;;  %v120_v16 = vld [vmem:[#allocation5 + $0xf8] sm:$0xff]  ;;  %v248_v17 = vld [vmem:[#allocation5 + $0x308] sm:$0xff] }
  0x2e   :  { %334 = vmatpush.msrb.mxu0 %v228_v45  ;;  %357 = vmatpush.msrb.mxu1 %v260_v50  ;;  %v113_v19 = vld [vmem:[#allocation5 + $0xc0] sm:$0xff]  ;;  %v118_v21 = vld [vmem:[#allocation5 + $0xe8] sm:$0xff]  ;;  %v152_v22 = vld [vmem:[#allocation5 + $0x1f8] sm:$0xff] }
  0x2f   :  { %290 = vmatpush.msra.mxu2 %v223_v47  ;;  %313 = vmatpush.msra.mxu3 %v255_v48  ;;  %v145_v20 = vld [vmem:[#allocation5 + $0x1c0] sm:$0xff]  ;;  %v111_v23 = vld [vmem:[#allocation5 + $0xb0] sm:$0xff]  ;;  %v116_v25 = vld [vmem:[#allocation5 + $0xd8] sm:$0xff] }
  0x30   :  { %335 = vmatpush.msrb.mxu0 %v226_v49  ;;  %358 = vmatpush.msrb.mxu1 %v258_v54  ;;  %v143_v24 = vld [vmem:[#allocation5 + $0x1b0] sm:$0xff]  ;;  %v150_v26 = vld [vmem:[#allocation5 + $0x1e8] sm:$0xff]  ;;  %v109_v27 = vld [vmem:[#allocation5 + $0xa0] sm:$0xff] }
  0x31   :  { %291 = vmatpush.msra.mxu2 %v221_v51  ;;  %314 = vmatpush.msra.mxu3 %v253_v52  ;;  %v141_v28 = vld [vmem:[#allocation5 + $0x1a0] sm:$0xff]  ;;  %v114_v29 = vld [vmem:[#allocation5 + $0xc8] sm:$0xff]  ;;  %v148_v30 = vld [vmem:[#allocation5 + $0x1d8] sm:$0xff] }
  0x32   :  { %336 = vmatpush.msrb.mxu0 %v224_v53  ;;  %359 = vmatpush.msrb.mxu1 %v256_v58  ;;  %v107_v31 = vld [vmem:[#allocation5 + $0x90] sm:$0xff]  ;;  %v112_v33 = vld [vmem:[#allocation5 + $0xb8] sm:$0xff]  ;;  %v146_v34 = vld [vmem:[#allocation5 + $0x1c8] sm:$0xff] }
  0x33   :  { %292 = vmatpush.msra.mxu2 %v219_v55  ;;  %315 = vmatpush.msra.mxu3 %v251_v56  ;;  %v139_v32 = vld [vmem:[#allocation5 + $0x190] sm:$0xff]  ;;  %v105_v35 = vld [vmem:[#allocation5 + $0x80] sm:$0xff]  ;;  %v110_v41 = vld [vmem:[#allocation5 + $0xa8] sm:$0xff] }
  0x34   :  { %337 = vmatpush.msrb.mxu0 %v222_v57  ;;  %360 = vmatpush.msrb.mxu1 %v254_v62  ;;  %v137_v36 = vld [vmem:[#allocation5 + $0x180] sm:$0xff]  ;;  %v103_v37 = vld [vmem:[#allocation5 + $0x70] sm:$0xff]  ;;  %v144_v42 = vld [vmem:[#allocation5 + $0x1b8] sm:$0xff] }
  0x35   :  { %293 = vmatpush.msra.mxu2 %v217_v59  ;;  %316 = vmatpush.msra.mxu3 %v249_v60  ;;  %v135_v38 = vld [vmem:[#allocation5 + $0x170] sm:$0xff]  ;;  %v101_v39 = vld [vmem:[#allocation5 + $0x60] sm:$0xff]  ;;  %v108_v45 = vld [vmem:[#allocation5 + $0x98] sm:$0xff] }
  0x36   :  { %338 = vmatpush.msrb.mxu0 %v220_v61  ;;  %361 = vmatpush.msrb.mxu1 %v252_v9  ;;  %v133_v40 = vld [vmem:[#allocation5 + $0x160] sm:$0xff]  ;;  %v99_v43 = vld [vmem:[#allocation5 + $0x50] sm:$0xff]  ;;  %v142_v46 = vld [vmem:[#allocation5 + $0x1a8] sm:$0xff] }
  0x37   :  { %294 = vmatpush.msra.mxu2 %v215_v63  ;;  %317 = vmatpush.msra.mxu3 %v247_v5  ;;  %v131_v44 = vld [vmem:[#allocation5 + $0x150] sm:$0xff]  ;;  %v97_v47 = vld [vmem:[#allocation5 + $0x40] sm:$0xff]  ;;  %v106_v49 = vld [vmem:[#allocation5 + $0x88] sm:$0xff] }
  0x38   :  { %339 = vmatpush.msrb.mxu0 %v218_v8  ;;  %362 = vmatpush.msrb.mxu1 %v250_v13  ;;  %v129_v48 = vld [vmem:[#allocation5 + $0x140] sm:$0xff]  ;;  %v140_v50 = vld [vmem:[#allocation5 + $0x198] sm:$0xff]  ;;  %v95_v51 = vld [vmem:[#allocation5 + $0x30] sm:$0xff] }
  0x39   :  { %371 = vmatpush.msrb.mxu2 %v119_v6  ;;  %394 = vmatpush.msrb.mxu3 %v151_v7  ;;  %v127_v52 = vld [vmem:[#allocation5 + $0x130] sm:$0xff]  ;;  %v104_v53 = vld [vmem:[#allocation5 + $0x78] sm:$0xff]  ;;  %v138_v54 = vld [vmem:[#allocation5 + $0x188] sm:$0xff] }
  0x3a   :  { %340 = vmatpush.msrb.mxu0 %v216_v12  ;;  %363 = vmatpush.msrb.mxu1 %v248_v17  ;;  %v93_v55 = vld [vmem:[#allocation5 + $0x20] sm:$0xff]  ;;  %v102_v57 = vld [vmem:[#allocation5 + $0x68] sm:$0xff]  ;;  %v136_v58 = vld [vmem:[#allocation5 + $0x178] sm:$0xff]  ;;  %v939_v17 = vmul.f32 0.3, %v918_v2 }
  0x3b   :  { %372 = vmatpush.msrb.mxu2 %v117_v10  ;;  %395 = vmatpush.msrb.mxu3 %v149_v11  ;;  %v125_v56 = vld [vmem:[#allocation5 + $0x120] sm:$0xff]  ;;  %v91_v59 = vld [vmem:[#allocation5 + $0x10] sm:$0xff]  ;;  %v100_v61 = vld [vmem:[#allocation5 + $0x58] sm:$0xff] }
  0x3c   :  { %417 = vmatpush.msra.mxu0 %v120_v16  ;;  %440 = vmatpush.msra.mxu1 %v152_v22  ;;  %v123_v60 = vld [vmem:[#allocation5 + $0x110] sm:$0xff]  ;;  %v134_v62 = vld [vmem:[#allocation5 + $0x168] sm:$0xff]  ;;  %v89_v63 = vld [vmem:[#allocation5] sm:$0xff] }
  0x3d   :  { %373 = vmatpush.msrb.mxu2 %v115_v14  ;;  %396 = vmatpush.msrb.mxu3 %v147_v15  ;;  %v121_v5 = vld [vmem:[#allocation5 + $0x100] sm:$0xff]  ;;  %v98_v6 = vld [vmem:[#allocation5 + $0x48] sm:$0xff]  ;;  %v132_v7 = vld [vmem:[#allocation5 + $0x158] sm:$0xff] }
  0x3e   :  { %418 = vmatpush.msra.mxu0 %v118_v21  ;;  %441 = vmatpush.msra.mxu1 %v150_v26  ;;  %v96_v8 = vld [vmem:[#allocation5 + $0x38] sm:$0xff]  ;;  %v130_v9 = vld [vmem:[#allocation5 + $0x148] sm:$0xff]  ;;  %v947_v26 = vmul.f32 0.3, %v914_v0 }
  0x3f   :  { %374 = vmatpush.msrb.mxu2 %v113_v19  ;;  %397 = vmatpush.msrb.mxu3 %v145_v20  ;;  %v94_v10 = vld [vmem:[#allocation5 + $0x28] sm:$0xff]  ;;  %v128_v11 = vld [vmem:[#allocation5 + $0x138] sm:$0xff]  ;;  %v942_v19 = vmul.f32 0.3, %v922_v3 }
  0x40   :  { %419 = vmatpush.msra.mxu0 %v116_v25  ;;  %442 = vmatpush.msra.mxu1 %v148_v30  ;;  %v92_v12 = vld [vmem:[#allocation5 + $0x18] sm:$0xff]  ;;  %v126_v13 = vld [vmem:[#allocation5 + $0x128] sm:$0xff] }
  0x41   :  { %375 = vmatpush.msrb.mxu2 %v111_v23  ;;  %398 = vmatpush.msrb.mxu3 %v143_v24  ;;  %v90_v14 = vld [vmem:[#allocation5 + $0x8] sm:$0xff]  ;;  %v124_v15 = vld [vmem:[#allocation5 + $0x118] sm:$0xff] }
  0x42   :  { %420 = vmatpush.msra.mxu0 %v114_v29  ;;  %443 = vmatpush.msra.mxu1 %v146_v34  ;;  %v122_v16 = vld [vmem:[#allocation5 + $0x108] sm:$0xff]  ;;  %v549_v34 = vld [vmem:[#allocation5 + $0x4f8] sm:$0xff] }
  0x43   :  { %376 = vmatpush.msrb.mxu2 %v109_v27  ;;  %399 = vmatpush.msrb.mxu3 %v141_v28  ;;  %v950_v27 = vmul.f32 0.3, %v916_v1 }
  0x44   :  { %421 = vmatpush.msra.mxu0 %v112_v33  ;;  %444 = vmatpush.msra.mxu1 %v144_v42  ;;  %v543_v42 = vld [vmem:[#allocation5 + $0x4c8] sm:$0xff] }
  0x45   :  { %377 = vmatpush.msrb.mxu2 %v107_v31  ;;  %400 = vmatpush.msrb.mxu3 %v139_v32 }
  0x46   :  { %422 = vmatpush.msra.mxu0 %v110_v41  ;;  %445 = vmatpush.msra.mxu1 %v142_v46  ;;  %v574_v41 = vld [vmem:[#allocation5 + $0x5c0] sm:$0xff]  ;;  %v541_v46 = vld [vmem:[#allocation5 + $0x4b8] sm:$0xff] }
  0x47   :  { %378 = vmatpush.msrb.mxu2 %v105_v35  ;;  %401 = vmatpush.msrb.mxu3 %v137_v36  ;;  %v578_v35 = vld [vmem:[#allocation5 + $0x5e0] sm:$0xff]  ;;  %v547_v36 = vld [vmem:[#allocation5 + $0x4e8] sm:$0xff] }
  0x48   :  { %423 = vmatpush.msra.mxu0 %v108_v45  ;;  %446 = vmatpush.msra.mxu1 %v140_v50  ;;  %v572_v45 = vld [vmem:[#allocation5 + $0x5b0] sm:$0xff]  ;;  %v539_v50 = vld [vmem:[#allocation5 + $0x4a8] sm:$0xff] }
  0x49   :  { %379 = vmatpush.msrb.mxu2 %v103_v37  ;;  %402 = vmatpush.msrb.mxu3 %v135_v38  ;;  %v544_v37 = vld [vmem:[#allocation5 + $0x4d0] sm:$0xff] }
  0x4a   :  { %424 = vmatpush.msra.mxu0 %v106_v49  ;;  %447 = vmatpush.msra.mxu1 %v138_v54  ;;  %v576_v38 = vld [vmem:[#allocation5 + $0x5d0] sm:$0xff]  ;;  %v570_v49 = vld [vmem:[#allocation5 + $0x5a0] sm:$0xff]  ;;  %v537_v54 = vld [vmem:[#allocation5 + $0x498] sm:$0xff] }
  0x4b   :  { %380 = vmatpush.msrb.mxu2 %v101_v39  ;;  %403 = vmatpush.msrb.mxu3 %v133_v40  ;;  %v545_v39 = vld [vmem:[#allocation5 + $0x4d8] sm:$0xff]  ;;  %v542_v40 = vld [vmem:[#allocation5 + $0x4c0] sm:$0xff] }
  0x4c   :  { %425 = vmatpush.msra.mxu0 %v104_v53  ;;  %448 = vmatpush.msra.mxu1 %v136_v58  ;;  %v568_v53 = vld [vmem:[#allocation5 + $0x590] sm:$0xff]  ;;  %v535_v58 = vld [vmem:[#allocation5 + $0x488] sm:$0xff] }
  0x4d   :  { %381 = vmatpush.msrb.mxu2 %v99_v43  ;;  %404 = vmatpush.msrb.mxu3 %v131_v44  ;;  %v575_v43 = vld [vmem:[#allocation5 + $0x5c8] sm:$0xff]  ;;  %v540_v44 = vld [vmem:[#allocation5 + $0x4b0] sm:$0xff] }
  0x4e   :  { %426 = vmatpush.msra.mxu0 %v102_v57  ;;  %449 = vmatpush.msra.mxu1 %v134_v62  ;;  %v566_v57 = vld [vmem:[#allocation5 + $0x580] sm:$0xff]  ;;  %v533_v62 = vld [vmem:[#allocation5 + $0x478] sm:$0xff] }
  0x4f   :  { %382 = vmatpush.msrb.mxu2 %v97_v47  ;;  %405 = vmatpush.msrb.mxu3 %v129_v48  ;;  %v573_v47 = vld [vmem:[#allocation5 + $0x5b8] sm:$0xff]  ;;  %v538_v48 = vld [vmem:[#allocation5 + $0x4a0] sm:$0xff] }
  0x50   :  { %427 = vmatpush.msra.mxu0 %v100_v61  ;;  %450 = vmatpush.msra.mxu1 %v132_v7  ;;  %v564_v61 = vld [vmem:[#allocation5 + $0x570] sm:$0xff]  ;;  %v531_v7 = vld [vmem:[#allocation5 + $0x468] sm:$0xff] }
  0x51   :  { %383 = vmatpush.msrb.mxu2 %v95_v51  ;;  %406 = vmatpush.msrb.mxu3 %v127_v52  ;;  %v571_v51 = vld [vmem:[#allocation5 + $0x5a8] sm:$0xff]  ;;  %v536_v52 = vld [vmem:[#allocation5 + $0x490] sm:$0xff] }
  0x52   :  { %428 = vmatpush.msra.mxu0 %v98_v6  ;;  %451 = vmatpush.msra.mxu1 %v130_v9  ;;  %v562_v6 = vld [vmem:[#allocation5 + $0x560] sm:$0xff]  ;;  %v528_v9 = vld [vmem:[#allocation5 + $0x450] sm:$0xff] }
  0x53   :  { %384 = vmatpush.msrb.mxu2 %v93_v55  ;;  %407 = vmatpush.msrb.mxu3 %v125_v56  ;;  %v569_v55 = vld [vmem:[#allocation5 + $0x598] sm:$0xff]  ;;  %v534_v56 = vld [vmem:[#allocation5 + $0x480] sm:$0xff] }
  0x54   :  { %429 = vmatpush.msra.mxu0 %v96_v8  ;;  %452 = vmatpush.msra.mxu1 %v128_v11  ;;  %v563_v8 = vld [vmem:[#allocation5 + $0x568] sm:$0xff]  ;;  %v529_v11 = vld [vmem:[#allocation5 + $0x458] sm:$0xff] }
  0x55   :  { %385 = vmatpush.msrb.mxu2 %v91_v59  ;;  %408 = vmatpush.msrb.mxu3 %v123_v60  ;;  %v567_v59 = vld [vmem:[#allocation5 + $0x588] sm:$0xff]  ;;  %v532_v60 = vld [vmem:[#allocation5 + $0x470] sm:$0xff] }
  0x56   :  { %430 = vmatpush.msra.mxu0 %v94_v10  ;;  %453 = vmatpush.msra.mxu1 %v126_v13  ;;  %v560_v10 = vld [vmem:[#allocation5 + $0x550] sm:$0xff]  ;;  %v526_v13 = vld [vmem:[#allocation5 + $0x440] sm:$0xff] }
  0x57   :  { %386 = vmatpush.msrb.mxu2 %v89_v63  ;;  %409 = vmatpush.msrb.mxu3 %v121_v5  ;;  %v565_v63 = vld [vmem:[#allocation5 + $0x578] sm:$0xff]  ;;  %v530_v5 = vld [vmem:[#allocation5 + $0x460] sm:$0xff] }
  0x58   :  { %431 = vmatpush.msra.mxu0 %v92_v12  ;;  %454 = vmatpush.msra.mxu1 %v124_v15  ;;  %v561_v12 = vld [vmem:[#allocation5 + $0x558] sm:$0xff]  ;;  %v527_v15 = vld [vmem:[#allocation5 + $0x448] sm:$0xff] }
  0x5a   :  { %432 = vmatpush.msra.mxu0 %v90_v14  ;;  %455 = vmatpush.msra.mxu1 %v122_v16  ;;  %v558_v14 = vld [vmem:[#allocation5 + $0x540] sm:$0xff]  ;;  %v559_v16 = vld [vmem:[#allocation5 + $0x548] sm:$0xff] }
  0x95   :  { %v177_v20 = vpop.f32.mrf.mxu0  ;;  %v200_v21 = vpop.f32.mrf.mxu1 }
  0x96   :  { %v206_v22 = vmul.f32 0.7, %v177_v20  ;;  %v207_v23 = vmul.f32 0.7, %v200_v21  ;;  %v524_v20 = vld [vmem:[#allocation5 + $0x430] sm:$0xff] }
  0x97   :  { %v556_v21 = vld [vmem:[#allocation5 + $0x530] sm:$0xff] }
  0x98   :  { %v210_v24 = vadd.f32 %v206_v22, %v939_v17  ;;  %v211_v25 = vadd.f32 %v207_v23, %v942_v19  ;;  %v525_v22 = vld [vmem:[#allocation5 + $0x438] sm:$0xff] }
  0x99   :  { %v557_v23 = vld [vmem:[#allocation5 + $0x538] sm:$0xff] }
  0x9a   :  { %295 = vmatmul.f32.vlgmr.msra.gmra.mxu2 %v210_v24  ;;  %318 = vmatmul.f32.vlgmr.msra.gmra.mxu3 %v211_v25 }
  0x9b   :  { %341 = vmatmul.f32.vlgmr.msrb.gmra.mxu0 %v210_v24  ;;  %364 = vmatmul.f32.vlgmr.msrb.gmra.mxu1 %v211_v25 }
  0x9d   :  { %v180_v28 = vpop.f32.mrf.mxu0  ;;  %v203_v29 = vpop.f32.mrf.mxu1 }
  0x9e   :  { %v208_v30 = vmul.f32 0.7, %v180_v28  ;;  %v209_v31 = vmul.f32 0.7, %v203_v29  ;;  %v522_v29 = vld [vmem:[#allocation5 + $0x420] sm:$0xff] }
  0xa0   :  { %v212_v32 = vadd.f32 %v208_v30, %v947_v26  ;;  %v213_v33 = vadd.f32 %v209_v31, %v950_v27  ;;  %v554_v30 = vld [vmem:[#allocation5 + $0x520] sm:$0xff]  ;;  %v523_v31 = vld [vmem:[#allocation5 + $0x428] sm:$0xff] }
  0xa2   :  { %298 = vmatmul.f32.gmra.mxu2 %v212_v32  ;;  %321 = vmatmul.f32.gmra.mxu3 %v213_v33 }
  0xa3   :  { %344 = vmatmul.f32.gmra.mxu0 %v212_v32  ;;  %367 = vmatmul.f32.gmra.mxu1 %v213_v33 }
  0xa4   :  { %477 = vmatpush.msra.mxu2 %v212_v32  ;;  %500 = vmatpush.msra.mxu3 %v213_v33  ;;  %v555_v32 = vld [vmem:[#allocation5 + $0x528] sm:$0xff]  ;;  %v520_v33 = vld [vmem:[#allocation5 + $0x410] sm:$0xff] }
  0xa6   :  { %478 = vmatpush.msra.mxu2 %v210_v24  ;;  %501 = vmatpush.msra.mxu3 %v211_v25 }
  0xaa   :  { %387 = vmatmul.f32.vlgmr.msrb.gmra.mxu2 %v918_v2  ;;  %410 = vmatmul.f32.vlgmr.msrb.gmra.mxu3 %v922_v3 }
  0xab   :  { %433 = vmatmul.f32.vlgmr.msra.gmra.mxu0 %v918_v2  ;;  %456 = vmatmul.f32.vlgmr.msra.gmra.mxu1 %v922_v3  ;;  %v548_v2 = vld [vmem:[#allocation5 + $0x4f0] sm:$0xff] }
  0xac   :  { %v580_v3 = vld [vmem:[#allocation5 + $0x5f0] sm:$0xff]  ;;  %582 = vmatpush.msrb.mxu0 %v548_v2  ;;  %628 = vmatpush.msrb.mxu2 %v549_v34  ;;  %v553_v34 = vld [vmem:[#allocation5 + $0x518] sm:$0xff] }
  0xad   :  { %605 = vmatpush.msrb.mxu1 %v580_v3  ;;  %v552_v2 = vld [vmem:[#allocation5 + $0x510] sm:$0xff]  ;;  %v521_v3 = vld [vmem:[#allocation5 + $0x418] sm:$0xff] }
  0xae   :  { %629 = vmatpush.msrb.mxu2 %v547_v36  ;;  %v551_v36 = vld [vmem:[#allocation5 + $0x508] sm:$0xff] }
  0xaf   :  { %606 = vmatpush.msrb.mxu1 %v578_v35  ;;  %v519_v35 = vld [vmem:[#allocation5 + $0x408] sm:$0xff] }
  0xb0   :  { %630 = vmatpush.msrb.mxu2 %v545_v39 }
  0xb1   :  { %607 = vmatpush.msrb.mxu1 %v576_v38 }
  0xb2   :  { %390 = vmatmul.f32.gmra.mxu2 %v914_v0  ;;  %413 = vmatmul.f32.gmra.mxu3 %v916_v1 }
  0xb3   :  { %436 = vmatmul.f32.gmra.mxu0 %v914_v0  ;;  %459 = vmatmul.f32.gmra.mxu1 %v916_v1  ;;  %v581_v0 = vld [vmem:[#allocation5 + $0x5f8] sm:$0xff]  ;;  %v546_v1 = vld [vmem:[#allocation5 + $0x4e0] sm:$0xff] }
  0xb4   :  { %651 = vmatpush.msrb.mxu3 %v581_v0  ;;  %583 = vmatpush.msrb.mxu0 %v546_v1  ;;  %v518_v0 = vld [vmem:[#allocation5 + $0x400] sm:$0xff] }
  0xb5   :  { %608 = vmatpush.msrb.mxu1 %v574_v41  ;;  %631 = vmatpush.msrb.mxu2 %v543_v42  ;;  %v550_v1 = vld [vmem:[#allocation5 + $0x500] sm:$0xff] }
  0xb6   :  { %584 = vmatpush.msrb.mxu0 %v544_v37 }
  0xb7   :  { %609 = vmatpush.msrb.mxu1 %v572_v45  ;;  %632 = vmatpush.msrb.mxu2 %v541_v46 }
  0xb8   :  { %585 = vmatpush.msrb.mxu0 %v542_v40 }
  0xb9   :  { %610 = vmatpush.msrb.mxu1 %v570_v49  ;;  %633 = vmatpush.msrb.mxu2 %v539_v50 }
  0xba   :  { %721 = vmatmul.msk.f32.vlgmr.msra.gmra.mxu2 %vm153_vm0, %v924_v4  ;;  %723 = vmatmul.msk.f32.vlgmr.msra.gmra.mxu3 %vm153_vm0, %v924_v4  ;;  %v579_v4 = vld [vmem:[#allocation5 + $0x5e8] sm:$0xff] }
  0xbb   :  { %652 = vmatpush.msrb.mxu3 %v579_v4  ;;  %586 = vmatpush.msrb.mxu0 %v540_v44 }
  0xbc   :  { %611 = vmatpush.msrb.mxu1 %v568_v53  ;;  %634 = vmatpush.msrb.mxu2 %v537_v54 }
  0xbd   :  { %587 = vmatpush.msrb.mxu0 %v538_v48 }
  0xbe   :  { %612 = vmatpush.msrb.mxu1 %v566_v57  ;;  %635 = vmatpush.msrb.mxu2 %v535_v58 }
  0xbf   :  { %588 = vmatpush.msrb.mxu0 %v536_v52 }
  0xc0   :  { %613 = vmatpush.msrb.mxu1 %v564_v61  ;;  %636 = vmatpush.msrb.mxu2 %v533_v62 }
  0xc1   :  { %589 = vmatpush.msrb.mxu0 %v534_v56 }
  0xc2   :  { %722 = vmatmul.msk.f32.gmra.mxu2 %vm153_vm0, %v932_v18  ;;  %724 = vmatmul.msk.f32.gmra.mxu3 %vm153_vm0, %v932_v18  ;;  %v577_v18 = vld [vmem:[#allocation5 + $0x5d8] sm:$0xff] }
  0xc3   :  { %653 = vmatpush.msrb.mxu3 %v577_v18  ;;  %590 = vmatpush.msrb.mxu0 %v532_v60 }
  0xc4   :  { %614 = vmatpush.msrb.mxu1 %v562_v6  ;;  %637 = vmatpush.msrb.mxu2 %v531_v7 }
  0xc5   :  { %654 = vmatpush.msrb.mxu3 %v575_v43  ;;  %591 = vmatpush.msrb.mxu0 %v530_v5  ;;  %v678_v5 = vld [vmem:[#allocation7] sm:$0x3] }
  0xc6   :  { %615 = vmatpush.msrb.mxu1 %v560_v10  ;;  %638 = vmatpush.msrb.mxu2 %v529_v11 }
  0xc7   :  { %655 = vmatpush.msrb.mxu3 %v573_v47  ;;  %592 = vmatpush.msrb.mxu0 %v528_v9  ;;  %v680_v9 = vperm.slane %v678_v5, 0 }
  0xc8   :  { %616 = vmatpush.msrb.mxu1 %v558_v14  ;;  %639 = vmatpush.msrb.mxu2 %v527_v15 }
  0xc9   :  { %656 = vmatpush.msrb.mxu3 %v571_v51  ;;  %593 = vmatpush.msrb.mxu0 %v526_v13 }
  0xca   :  { %617 = vmatpush.msrb.mxu1 %v556_v21  ;;  %640 = vmatpush.msrb.mxu2 %v525_v22 }
  0xcb   :  { %657 = vmatpush.msrb.mxu3 %v569_v55  ;;  %594 = vmatpush.msrb.mxu0 %v524_v20  ;;  %v681_v20 = vperm.slane %v678_v5, 1 }
  0xcc   :  { %618 = vmatpush.msrb.mxu1 %v554_v30  ;;  %641 = vmatpush.msrb.mxu2 %v523_v31 }
  0xcd   :  { %658 = vmatpush.msrb.mxu3 %v567_v59  ;;  %595 = vmatpush.msrb.mxu0 %v522_v29 }
  0xce   :  { %619 = vmatpush.msrb.mxu1 %v552_v2  ;;  %642 = vmatpush.msrb.mxu2 %v521_v3 }
  0xcf   :  { %659 = vmatpush.msrb.mxu3 %v565_v63  ;;  %596 = vmatpush.msrb.mxu0 %v520_v33 }
  0xd0   :  { %620 = vmatpush.msrb.mxu1 %v550_v1  ;;  %643 = vmatpush.msrb.mxu2 %v519_v35 }
  0xd1   :  { %660 = vmatpush.msrb.mxu3 %v563_v8  ;;  %597 = vmatpush.msrb.mxu0 %v518_v0 }
  0xd3   :  { %661 = vmatpush.msrb.mxu3 %v561_v12 }
  0xd5   :  { %662 = vmatpush.msrb.mxu3 %v559_v16 }
  0xd7   :  { %663 = vmatpush.msrb.mxu3 %v557_v23 }
  0xd9   :  { %664 = vmatpush.msrb.mxu3 %v555_v32 }
  0xdb   :  { %665 = vmatpush.msrb.mxu3 %v553_v34 }
  0xdd   :  { %666 = vmatpush.msrb.mxu3 %v551_v36 }
 0x118   :  { %v342_v58 = vpop.f32.mrf.mxu0 }
 0x11d   :  { %v296_v24 = vpop.f32.mrf.mxu2  ;;  %v319_v25 = vpop.f32.mrf.mxu3 }
 0x11e   :  { %v320_v28 = vadd.f32 %v319_v25, %v296_v24 }
 0x120   :  { %v345_v59 = vpop.f32.mrf.mxu0 }
 0x125   :  { %v299_v4 = vpop.f32.mrf.mxu2  ;;  %v322_v37 = vpop.f32.mrf.mxu3 }
 0x126   :  { %v323_v38 = vadd.f32 %v322_v37, %v299_v4 }
 0x128   :  { %v434_v60 = vpop.f32.mrf.mxu0 }
 0x12d   :  { %v388_v39 = vpop.f32.mrf.mxu2  ;;  %v411_v18 = vpop.f32.mrf.mxu3 }
 0x12e   :  { %v389_v40 = vadd.f32 %v388_v39, %v320_v28 }
 0x130   :  { %v412_v41 = vadd.f32 %v411_v18, %v389_v40  ;;  %v437_v62 = vpop.f32.mrf.mxu0 }
 0x135   :  { %v391_v42 = vpop.f32.mrf.mxu2  ;;  %v414_v43 = vpop.f32.mrf.mxu3 }
 0x136   :  { %v392_v44 = vadd.f32 %v391_v42, %v323_v38 }
 0x138   :  { %v415_v45 = vadd.f32 %v414_v43, %v392_v44 }
 0x13d   :  { %v480_v46 = vpop.f32.mrf.mxu2  ;;  %v503_v47 = vpop.f32.mrf.mxu3 }
 0x13e   :  { %v509_v48 = vmul.f32 0.7, %v480_v46  ;;  %v510_v49 = vmul.f32 0.7, %v503_v47 }
 0x140   :  { %v513_v50 = vadd.f32 %v509_v48, %v939_v17  ;;  %v514_v51 = vadd.f32 %v510_v49, %v942_v19  ;;  %v365_v17 = vpop.f32.mrf.mxu1 }
 0x142   :  { %598 = vmatmul.f32.vlgmr.msrb.gmra.mxu0 %v513_v50  ;;  %621 = vmatmul.f32.vlgmr.msrb.gmra.mxu1 %v514_v51 }
 0x143   :  { %644 = vmatmul.f32.vlgmr.msrb.gmra.mxu2 %v513_v50  ;;  %667 = vmatmul.f32.vlgmr.msrb.gmra.mxu3 %v514_v51 }
 0x145   :  { %v483_v52 = vpop.f32.mrf.mxu2  ;;  %v506_v53 = vpop.f32.mrf.mxu3 }
 0x146   :  { %v511_v54 = vmul.f32 0.7, %v483_v52  ;;  %v512_v55 = vmul.f32 0.7, %v506_v53 }
 0x148   :  { %v515_v56 = vadd.f32 %v511_v54, %v947_v26  ;;  %v516_v57 = vadd.f32 %v512_v55, %v950_v27  ;;  %v368_v19 = vpop.f32.mrf.mxu1  ;;  %v366_v26 = vadd.f32 %v365_v17, %v342_v58 }
 0x149   :  { %v369_v24 = vadd.f32 %v368_v19, %v345_v59 }
 0x14a   :  { %601 = vmatmul.f32.gmra.mxu0 %v515_v56  ;;  %624 = vmatmul.f32.gmra.mxu1 %v516_v57  ;;  %v435_v27 = vadd.f32 %v434_v60, %v366_v26 }
 0x14b   :  { %647 = vmatmul.f32.gmra.mxu2 %v515_v56  ;;  %670 = vmatmul.f32.gmra.mxu3 %v516_v57  ;;  %v438_v29 = vadd.f32 %v437_v62, %v369_v24 }
 0x150   :  { %v457_v61 = vpop.f32.mrf.mxu1 }
 0x151   :  { %v458_v15 = vadd.f32 %v457_v61, %v435_v27 }
 0x158   :  { %v460_v63 = vpop.f32.mrf.mxu1 }
 0x159   :  { %v461_v34 = vadd.f32 %v460_v63, %v438_v29 }
 0x1bf   :  { %v599_v6 = vpop.f32.mrf.mxu0  ;;  %v622_v7 = vpop.f32.mrf.mxu1 }
 0x1c0   :  { %v623_v8 = vadd.f32 %v622_v7, %v599_v6 }
 0x1c2   :  { %v674_v10 = vadd.f32 %v623_v8, %v412_v41 }
 0x1c4   :  { %v684_v11 = vadd.f32 %v680_v9, %v674_v10 }
 0x1c6   :  { %v688_v12 = vmax.f32 %v684_v11, 0.0  ;;  %v645_v13 = vpop.f32.mrf.mxu2  ;;  %v668_v14 = vpop.f32.mrf.mxu3 }
 0x1c7   :  { %v669_v16 = vadd.f32 %v668_v14, %v645_v13  ;;  %v602_v21 = vpop.f32.mrf.mxu0  ;;  %v625_v22 = vpop.f32.mrf.mxu1 }
 0x1c8   :  { %692 = vst [vmem:[#allocation10] sm:$0xff] %v688_v12  ;;  %v626_v23 = vadd.f32 %v625_v22, %v602_v21 }
 0x1c9   :  { %v675_v25 = vadd.f32 %v669_v16, %v458_v15 }
 0x1ca   :  { %v676_v28 = vadd.f32 %v626_v23, %v415_v45 }
 0x1cb   :  { %v685_v30 = vadd.f32 %v681_v20, %v675_v25 }
 0x1cc   :  { %v686_v31 = vadd.f32 %v680_v9, %v676_v28 }
 0x1cd   :  { %v689_v32 = vmax.f32 %v685_v30, 0.0 }
 0x1ce   :  { %v690_v33 = vmax.f32 %v686_v31, 0.0  ;;  %v648_v2 = vpop.f32.mrf.mxu2  ;;  %v671_v3 = vpop.f32.mrf.mxu3 }
 0x1cf   :  { %693 = vst [vmem:[#allocation10 + $0x8] sm:$0xff] %v689_v32  ;;  %v672_v0 = vadd.f32 %v671_v3, %v648_v2 }
 0x1d0   :  { %694 = vst [vmem:[#allocation10 + $0x10] sm:$0xff] %v690_v33 }
 0x1d1   :  { %v677_v1 = vadd.f32 %v672_v0, %v461_v34 }
 0x1d3   :  { %v687_v35 = vadd.f32 %v681_v20, %v677_v1 }
 0x1d5   :  { %v691_v36 = vmax.f32 %v687_v35, 0.0 }
 0x1d7   :  { %695 = vst [vmem:[#allocation10 + $0x18] sm:$0xff] %v691_v36 }
 0x1d8   :  { %708 = dma.vmem_to_hbm [thread:$0]  %s701_s3, 512, %s703_s13, [#allocation4], %s863_s23, %s863_s23, %s864_s24  }
 0x1d9   :  { %860 = dma.done.wait [#allocation4], 512  }
 0x1da   :  { %861 = vsyncadd [#allocation4], 4294966784 }
 0x1db   :  { %713 = vsyncpa [#allocation3], 1 }
 0x1dc   :  { %714 = vsyncpa [#allocation6], 1 }
 0x1dd   :  { %715 = vsyncpa [#allocation9], 1 }
 0x1de   :  { %716 = vsyncpa [#allocation4], 1 }

</bundles_post_ra>
